<compile_context>
chip_gen: v6e
topology: v6e:2x2x1
jax: 0.10.0
libtpu: 0.0.40
codegen_flags: <defaults>
</compile_context>

<pallas_src>
import jax
import jax.numpy as jnp
from jax.experimental import pallas as pl
from jax.experimental.pallas import tpu as pltpu

X_DIM = 150
H_DIM = 150
H2_DIM = 50
H3_DIM = 25
OUT_DIM = 2
IN_DIM = X_DIM + H_DIM  # 300


def stopsign_kernel(x_ref, w1_ref, b1_ref, w2_ref, b2_ref, w3_ref, b3_ref, o_ref):
    """One batch tile: three (matmul + bias + ReLU) layers, then 2-class softmax."""
    x = x_ref[...]  # (TB, IN_DIM) bf16

    # fc1 + ReLU   (bf16 MXU inputs, f32 accumulation; bias add in f32)
    h1 = jnp.dot(x, w1_ref[...], preferred_element_type=jnp.float32) + b1_ref[...]
    h1 = jnp.maximum(h1, 0.0).astype(jnp.bfloat16)

    # fc2 + ReLU
    h2 = jnp.dot(h1, w2_ref[...], preferred_element_type=jnp.float32) + b2_ref[...]
    h2 = jnp.maximum(h2, 0.0).astype(jnp.bfloat16)

    # fc3 + ReLU (kept f32 for the softmax) -- matches the PyTorch module, which
    # applies ReLU to the logits before nn.Softmax().
    h3 = jnp.dot(h2, w3_ref[...], preferred_element_type=jnp.float32) + b3_ref[...]
    h3 = jnp.maximum(h3, 0.0)  # (TB, 2) f32

    # Closed-form 2-class softmax: softmax([a, b]) == [sigmoid(a-b), sigmoid(b-a)].
    # Avoids XLU reduces on a 2-valid-lane axis and one exp; numerically identical
    # to jax.nn.softmax for 2 classes.
    d = h3[:, 0:1] - h3[:, 1:2]          # (TB, 1)
    p0 = 1.0 / (1.0 + jnp.exp(-d))       # sigmoid(d), EUP exp + divide (f32)
    out = jnp.concatenate([p0, 1.0 - p0], axis=1)
    o_ref[...] = out.astype(o_ref.dtype)


def stopsign_forward(x, params, *, block_b=512):
    """x: (B, 300) f32. params: (w1,b1,w2,b2,w3,b3) with w as [in,out], b as [1,out]."""
    w1, b1, w2, b2, w3, b3 = params
    B = x.shape[0]
    TB = min(block_b, B)                 # TB == B for small batches, else 512 (mult of 8)
    grid = (pl.cdiv(B, TB),)

    # bf16 for the streamed activations and the MXU weight inputs; biases stay f32.
    x_bf = x.astype(jnp.bfloat16)
    w1b, w2b, w3b = (w.astype(jnp.bfloat16) for w in (w1, w2, w3))
    b1f, b2f, b3f = (b.astype(jnp.float32) for b in (b1, b2, b3))

    def resident(shape):
        # Same block every grid step -> weight/bias stays resident in VMEM.
        return pl.BlockSpec(shape, lambda i: (0, 0))

    grid_spec = pltpu.PrefetchScalarGridSpec(
        num_scalar_prefetch=0,
        grid=grid,
        in_specs=[
            pl.BlockSpec((TB, IN_DIM), lambda i: (i, 0)),   # x: streamed per batch tile
            resident((IN_DIM, H2_DIM)),                     # w1
            resident((1, H2_DIM)),                          # b1
            resident((H2_DIM, H3_DIM)),                     # w2
            resident((1, H3_DIM)),                          # b2
            resident((H3_DIM, OUT_DIM)),                    # w3
            resident((1, OUT_DIM)),                         # b3
        ],
        out_specs=pl.BlockSpec((TB, OUT_DIM), lambda i: (i, 0)),
    )

    return pl.pallas_call(
        stopsign_kernel,
        out_shape=jax.ShapeDtypeStruct((B, OUT_DIM), jnp.float32),
        grid_spec=grid_spec,
        compiler_params=pltpu.CompilerParams(
            # Batch tiles are independent: lets v7x shard grid steps across its
            # two TensorCores; no-op (but harmless) on v5e/v6e.
            dimension_semantics=("parallel",),
        ),
    )(x_bf, w1b, b1f, w2b, b2f, w3b, b3f)


def init_params(key):
    # Deterministic synthetic init (PyTorch-style uniform bounds), weights
    # pre-transposed to [in, out]; biases kept 2D [1, out].
    keys = jax.random.split(key, 6)

    def linear(kw, kb, in_dim, out_dim):
        bound = 1.0 / jnp.sqrt(in_dim)
        w = jax.random.uniform(kw, (in_dim, out_dim), jnp.float32, -bound, bound)
        b = jax.random.uniform(kb, (1, out_dim), jnp.float32, -bound, bound)
        return w, b

    w1, b1 = linear(keys[0], keys[1], IN_DIM, H2_DIM)
    w2, b2 = linear(keys[2], keys[3], H2_DIM, H3_DIM)
    w3, b3 = linear(keys[4], keys[5], H3_DIM, OUT_DIM)
    return (w1, b1, w2, b2, w3, b3)


def reference_forward(x, params, dtype=jnp.float32):
    """Pure-JAX reference; dtype controls the matmul input precision."""
    w1, b1, w2, b2, w3, b3 = params

    def dot(a, w):
        return jnp.dot(a.astype(dtype), w.astype(dtype),
                       preferred_element_type=jnp.float32)

    h1 = jnp.maximum(dot(x, w1) + b1, 0.0)
    h2 = jnp.maximum(dot(h1, w2) + b2, 0.0)
    h3 = jnp.maximum(dot(h2, w3) + b3, 0.0)
    return jax.nn.softmax(h3, axis=-1)


if __name__ == "__main__":
    key = jax.random.PRNGKey(0)
    k_x, k_p, k_x2 = jax.random.split(key, 3)
    params = init_params(k_p)
    fwd = jax.jit(stopsign_forward)

    # Small batch: single grid step (TB == B).
    B = 8
    x = jax.random.normal(k_x, (B, IN_DIM), jnp.float32)
    out = jax.block_until_ready(fwd(x, params))
    assert out.shape == (B, OUT_DIM)
    ref_bf16 = reference_forward(x, params, dtype=jnp.bfloat16)
    ref_f32 = reference_forward(x, params, dtype=jnp.float32)
    assert jnp.allclose(out, ref_bf16, atol=2e-3, rtol=2e-3), \
        float(jnp.max(jnp.abs(out - ref_bf16)))
    assert jnp.allclose(out, ref_f32, atol=2e-2, rtol=0.0), \
        float(jnp.max(jnp.abs(out - ref_f32)))
    assert jnp.allclose(out.sum(axis=-1), 1.0, atol=1e-5)

    # Larger batch: exercises the batch grid (grid=(2,)) with resident weights.
    B2 = 1024
    x2 = jax.random.normal(k_x2, (B2, IN_DIM), jnp.float32)
    out2 = jax.block_until_ready(fwd(x2, params))
    ref2 = reference_forward(x2, params, dtype=jnp.bfloat16)
    assert out2.shape == (B2, OUT_DIM)
    assert jnp.allclose(out2, ref2, atol=2e-3, rtol=2e-3), \
        float(jnp.max(jnp.abs(out2 - ref2)))

    print("KERNEL_OK")
</pallas_src>

<mosaic_0001>
module attributes {stable_mosaic.version = 11 : i64} {
  func.func @stopsign_kernel(%arg0: i32, %arg1: memref<8x300xbf16, #tpu.memory_space<vmem>>, %arg2: memref<300x50xbf16, #tpu.memory_space<vmem>>, %arg3: memref<1x50xf32, #tpu.memory_space<vmem>>, %arg4: memref<50x25xbf16, #tpu.memory_space<vmem>>, %arg5: memref<1x25xf32, #tpu.memory_space<vmem>>, %arg6: memref<25x2xbf16, #tpu.memory_space<vmem>>, %arg7: memref<1x2xf32, #tpu.memory_space<vmem>>, %arg8: memref<8x2xf32, #tpu.memory_space<vmem>>) attributes {dimension_semantics = [#tpu.dimension_semantics<parallel>], iteration_bounds = array<i64: 1>, scalar_prefetch = 0 : i64, scratch_operands = 0 : i64, tpu.core_type = #tpu.core_type<tc>, window_params = [{transform_indices = @transform_0, window_bounds = array<i64: 8, 300>}, {pipeline_mode = #tpu.pipeline_mode<synchronous>, transform_indices = @transform_1, window_bounds = array<i64: 300, 50>}, {pipeline_mode = #tpu.pipeline_mode<synchronous>, transform_indices = @transform_2, window_bounds = array<i64: 1, 50>}, {pipeline_mode = #tpu.pipeline_mode<synchronous>, transform_indices = @transform_3, window_bounds = array<i64: 50, 25>}, {pipeline_mode = #tpu.pipeline_mode<synchronous>, transform_indices = @transform_4, window_bounds = array<i64: 1, 25>}, {pipeline_mode = #tpu.pipeline_mode<synchronous>, transform_indices = @transform_5, window_bounds = array<i64: 25, 2>}, {pipeline_mode = #tpu.pipeline_mode<synchronous>, transform_indices = @transform_6, window_bounds = array<i64: 1, 2>}, {transform_indices = @transform_7, window_bounds = array<i64: 8, 2>}]} {
    %c0 = arith.constant 0 : index
    %c0_0 = arith.constant 0 : index
    %0 = vector.load %arg1[%c0, %c0_0] : memref<8x300xbf16, #tpu.memory_space<vmem>>, vector<8x300xbf16>
    %c0_1 = arith.constant 0 : index
    %c0_2 = arith.constant 0 : index
    %1 = vector.load %arg2[%c0_1, %c0_2] : memref<300x50xbf16, #tpu.memory_space<vmem>>, vector<300x50xbf16>
    %cst = arith.constant dense<0.000000e+00> : vector<8x50xf32>
    %2 = tpu.matmul %0, %1, %cst {dimension_numbers = #tpu.dot_dimension_numbers<[1], [0], [0], [1], [0, 0, 1, 1], [], []>} : vector<8x300xbf16>, vector<300x50xbf16>, vector<8x50xf32> -> vector<8x50xf32>
    %c0_3 = arith.constant 0 : index
    %c0_4 = arith.constant 0 : index
    %3 = vector.load %arg3[%c0_3, %c0_4] : memref<1x50xf32, #tpu.memory_space<vmem>>, vector<1x50xf32>
    %4 = vector.broadcast %3 : vector<1x50xf32> to vector<8x50xf32>
    %5 = arith.addf %2, %4 : vector<8x50xf32>
    %cst_5 = arith.constant 0.000000e+00 : f32
    %6 = vector.broadcast %cst_5 : f32 to vector<8x50xf32>
    %7 = arith.maximumf %5, %6 : vector<8x50xf32>
    %8 = arith.truncf %7 : vector<8x50xf32> to vector<8x50xbf16>
    %c0_6 = arith.constant 0 : index
    %c0_7 = arith.constant 0 : index
    %9 = vector.load %arg4[%c0_6, %c0_7] : memref<50x25xbf16, #tpu.memory_space<vmem>>, vector<50x25xbf16>
    %cst_8 = arith.constant dense<0.000000e+00> : vector<8x25xf32>
    %10 = tpu.matmul %8, %9, %cst_8 {dimension_numbers = #tpu.dot_dimension_numbers<[1], [0], [0], [1], [0, 0, 1, 1], [], []>} : vector<8x50xbf16>, vector<50x25xbf16>, vector<8x25xf32> -> vector<8x25xf32>
    %c0_9 = arith.constant 0 : index
    %c0_10 = arith.constant 0 : index
    %11 = vector.load %arg5[%c0_9, %c0_10] : memref<1x25xf32, #tpu.memory_space<vmem>>, vector<1x25xf32>
    %12 = vector.broadcast %11 : vector<1x25xf32> to vector<8x25xf32>
    %13 = arith.addf %10, %12 : vector<8x25xf32>
    %cst_11 = arith.constant 0.000000e+00 : f32
    %14 = vector.broadcast %cst_11 : f32 to vector<8x25xf32>
    %15 = arith.maximumf %13, %14 : vector<8x25xf32>
    %16 = arith.truncf %15 : vector<8x25xf32> to vector<8x25xbf16>
    %c0_12 = arith.constant 0 : index
    %c0_13 = arith.constant 0 : index
    %17 = vector.load %arg6[%c0_12, %c0_13] : memref<25x2xbf16, #tpu.memory_space<vmem>>, vector<25x2xbf16>
    %cst_14 = arith.constant dense<0.000000e+00> : vector<8x2xf32>
    %18 = tpu.matmul %16, %17, %cst_14 {dimension_numbers = #tpu.dot_dimension_numbers<[1], [0], [0], [1], [0, 0, 1, 1], [], []>} : vector<8x25xbf16>, vector<25x2xbf16>, vector<8x2xf32> -> vector<8x2xf32>
    %c0_15 = arith.constant 0 : index
    %c0_16 = arith.constant 0 : index
    %19 = vector.load %arg7[%c0_15, %c0_16] : memref<1x2xf32, #tpu.memory_space<vmem>>, vector<1x2xf32>
    %20 = vector.broadcast %19 : vector<1x2xf32> to vector<8x2xf32>
    %21 = arith.addf %18, %20 : vector<8x2xf32>
    %cst_17 = arith.constant 0.000000e+00 : f32
    %22 = vector.broadcast %cst_17 : f32 to vector<8x2xf32>
    %23 = arith.maximumf %21, %22 : vector<8x2xf32>
    %24 = vector.extract_strided_slice %23 {offsets = [0, 0], sizes = [8, 1], strides = [1, 1]} : vector<8x2xf32> to vector<8x1xf32>
    %25 = vector.extract_strided_slice %23 {offsets = [0, 1], sizes = [8, 1], strides = [1, 1]} : vector<8x2xf32> to vector<8x1xf32>
    %26 = arith.subf %24, %25 : vector<8x1xf32>
    %cst_18 = arith.constant 0.000000e+00 : f32
    %27 = vector.broadcast %cst_18 : f32 to vector<8x1xf32>
    %28 = arith.subf %27, %26 : vector<8x1xf32>
    %29 = math.exp %28 : vector<8x1xf32>
    %cst_19 = arith.constant 1.000000e+00 : f32
    %30 = vector.broadcast %cst_19 : f32 to vector<8x1xf32>
    %31 = arith.addf %30, %29 : vector<8x1xf32>
    %cst_20 = arith.constant 1.000000e+00 : f32
    %32 = vector.broadcast %cst_20 : f32 to vector<8x1xf32>
    %33 = arith.divf %32, %31 : vector<8x1xf32>
    %cst_21 = arith.constant 1.000000e+00 : f32
    %34 = vector.broadcast %cst_21 : f32 to vector<8x1xf32>
    %35 = arith.subf %34, %33 : vector<8x1xf32>
    %36 = tpu.concatenate %33, %35 in 1 : vector<8x1xf32>, vector<8x1xf32> -> vector<8x2xf32>
    %c0_22 = arith.constant 0 : index
    %c0_23 = arith.constant 0 : index
    %37 = vector.load %arg8[%c0_22, %c0_23] : memref<8x2xf32, #tpu.memory_space<vmem>>, vector<8x2xf32>
    tpu.vector_store %arg8[%c0_22, %c0_23], %36 {strides = array<i32>} : memref<8x2xf32, #tpu.memory_space<vmem>>, vector<8x2xf32>,
    return
  }
  func.func @transform_0(%arg0: i32) -> (i32, i32) {
    %c0_i32 = arith.constant 0 : i32
    %c0_i32_0 = arith.constant 0 : i32
    return %arg0, %c0_i32 : i32, i32
  }
  func.func @transform_1(%arg0: i32) -> (i32, i32) {
    %c0_i32 = arith.constant 0 : i32
    %c0_i32_0 = arith.constant 0 : i32
    %c0_i32_1 = arith.constant 0 : i32
    return %c0_i32, %c0_i32_0 : i32, i32
  }
  func.func @transform_2(%arg0: i32) -> (i32, i32) {
    %c0_i32 = arith.constant 0 : i32
    %c0_i32_0 = arith.constant 0 : i32
    %c0_i32_1 = arith.constant 0 : i32
    return %c0_i32, %c0_i32_0 : i32, i32
  }
  func.func @transform_3(%arg0: i32) -> (i32, i32) {
    %c0_i32 = arith.constant 0 : i32
    %c0_i32_0 = arith.constant 0 : i32
    %c0_i32_1 = arith.constant 0 : i32
    return %c0_i32, %c0_i32_0 : i32, i32
  }
  func.func @transform_4(%arg0: i32) -> (i32, i32) {
    %c0_i32 = arith.constant 0 : i32
    %c0_i32_0 = arith.constant 0 : i32
    %c0_i32_1 = arith.constant 0 : i32
    return %c0_i32, %c0_i32_0 : i32, i32
  }
  func.func @transform_5(%arg0: i32) -> (i32, i32) {
    %c0_i32 = arith.constant 0 : i32
    %c0_i32_0 = arith.constant 0 : i32
    %c0_i32_1 = arith.constant 0 : i32
    return %c0_i32, %c0_i32_0 : i32, i32
  }
  func.func @transform_6(%arg0: i32) -> (i32, i32) {
    %c0_i32 = arith.constant 0 : i32
    %c0_i32_0 = arith.constant 0 : i32
    %c0_i32_1 = arith.constant 0 : i32
    return %c0_i32, %c0_i32_0 : i32, i32
  }
  func.func @transform_7(%arg0: i32) -> (i32, i32) {
    %c0_i32 = arith.constant 0 : i32
    %c0_i32_0 = arith.constant 0 : i32
    return %arg0, %c0_i32 : i32, i32
  }
}

</mosaic_0001>

<bundles_post_ra>
// kernel: stopsign_forward.1
= control target key start
LH: loop header
LB: loop body
LE: loop exit
PB: predicated region body
PF: predicated region fallthrough
CT: control target
= control target key end

     0   :  { %v605_v1 = vmov 0.0   ;;  %vm606_vm0 = vmmov 0   ;;  %vm201_vm1 = vcmask 1045504   ;;  %vm326_vm2 = vcmask 1040384   ;;  %s758_s1 = inlined_call_operand.vmem [shape: bf16[300,50], index: 1, kind: input, shape index: {}]   ;;  %s759_s0 = inlined_call_operand.vmem [shape: bf16[8,300], index: 0, kind: input, shape index: {}]   ;;  %s760_s3 = inlined_call_operand.vmem [shape: bf16[50,25], index: 3, kind: input, shape index: {}]   ;;  %s761_s5 = inlined_call_operand.vmem [shape: bf16[25,2], index: 5, kind: input, shape index: {}]   ;;  %s762_s2 = inlined_call_operand.vmem [shape: f32[1,50], index: 2, kind: input, shape index: {}]   ;;  %s763_s4 = inlined_call_operand.vmem [shape: f32[1,25], index: 4, kind: input, shape index: {}]   ;;  %s764_s6 = inlined_call_operand.vmem [shape: f32[1,2], index: 6, kind: input, shape index: {}]   ;;  %s765_s7 = inlined_call_operand.vmem [shape: f32[8,2], index: 7, kind: output, shape index: {}]  }
   0x1   :  { %v573_v0 = vld [vmem:[%s758_s1 + $0x78] sm:$0xff]   ;;  %538 = vmatprep.subr.bf16.mxu1 %v605_v1  ;;  %544 = vmatprep.mubr.msk.bf16.mxu1 %vm606_vm0, %v605_v1  ;;  %v575_v3 = vld [vmem:[%s758_s1 + $0x70] sm:$0xff]   ;;  %v577_v5 = vld [vmem:[%s758_s1 + $0x68] sm:$0xff]   ;;  %vm197_vm3 = vcmask 359424   ;;  %vm398_vm4 = vcmask 1043456   ;;  %vm399_vm5 = vcmask 1044480  }
   0x2   :  { %v574_v2 = vld [vmem:[%s758_s1 + $0x38] sm:$0xff]   ;;  %504 = vmatprep.subr.bf16.mxu0 %v573_v0  ;;  %v576_v4 = vld [vmem:[%s758_s1 + $0x30] sm:$0xff]   ;;  %v578_v6 = vld [vmem:[%s758_s1 + $0x28] sm:$0xff]   ;;  %v607_v39 = vmov 65535   ;;  %vm322_vm6 = vcmask 408576   ;;  %vm394_vm7 = vcmask 203776  }
   0x3   :  { %505 = vmatpush3.bf16.msra.mxu0 %v574_v2  ;;  %v579_v7 = vld [vmem:[%s758_s1 + $0x60] sm:$0xff]   ;;  %v581_v9 = vld [vmem:[%s758_s1 + $0x58] sm:$0xff]   ;;  %v585_v10 = vld [vmem:[%s758_s1 + $0x90] sm:$0x3f]   ;;  %v400_v40 = vsel %vm398_vm4, 4294967295, %v607_v39  ;;  %vm462_vm8 = vcmask 7168  }
   0x4   :  { %506 = vmatprep.subr.bf16.mxu0 %v575_v3  ;;  %v580_v8 = vld [vmem:[%s758_s1 + $0x20] sm:$0xff]   ;;  %v582_v11 = vld [vmem:[%s758_s1 + $0x18] sm:$0xff]   ;;  %v203_v12 = vsel %vm201_vm1, %v585_v10, 0  ;;  %v588_v13 = vld [vmem:[%s758_s1 + $0x88] sm:$0xff]   ;;  %v401_v45 = vsel %vm399_vm5, %v400_v40, 0  ;;  %vm464_vm9 = vcmask 15360  }
   0x5   :  { %539 = vmatpush3.bf16.msra.mxu1 %v203_v12  ;;  %v583_v14 = vld [vmem:[%s758_s1 + $0x50] sm:$0xff]   ;;  %v591_v16 = vld [vmem:[%s758_s1 + $0x80] sm:$0xff]   ;;  %v586_v18 = vld [vmem:[%s758_s1 + $0x48] sm:$0xff]  }
   0x6   :  { %540 = vmatprep.subr.bf16.mxu1 %v605_v1  ;;  %v584_v15 = vld [vmem:[%s758_s1 + $0x10] sm:$0xff]   ;;  %v27_v17 = vld [vmem:[%s759_s0] sm:$0xff]  ;;  %v595_v20 = vld [vmem:[%s760_s3 + $0x18] ss:$0 sps:$4 sm:$0x11]  }
   0x7   :  { %507 = vmatpush3.bf16.msra.mxu0 %v576_v4  ;;  %v472_v19 = vcombine.high %v27_v17, %v27_v17  ;;  %v594_v21 = vld [vmem:[%s759_s0 + $0x8] ss:$0 sps:$4 sm:$0xff]   ;;  %v589_v23 = vld [vmem:[%s758_s1 + $0x40] sm:$0xff]   ;;  %v328_v24 = vsel %vm326_vm2, %v595_v20, 0  ;;  %v471_v26 = vcombine.low %v27_v17, %v27_v17  ;;  %v596_v27 = vld [vmem:[%s760_s3 + $0x10] sm:$0xff]  }
   0x8   :  { %508 = vmatprep.subr.bf16.mxu0 %v577_v5  ;;  %v587_v22 = vld [vmem:[%s758_s1 + $0x8] sm:$0xff]   ;;  %v590_v25 = vld [vmem:[%s758_s1] sm:$0xff]  }
   0x9   :  { %541 = vmatpush3.bf16.msra.mxu1 %v588_v13  ;;  %237 = vmatprep.mubr.bf16.mxu0 %v472_v19  ;;  %v597_v28 = vld [vmem:[%s760_s3 + $0x8] sm:$0xff]   ;;  %v598_v29 = vld [vmem:[%s760_s3] sm:$0xff]  }
   0xa   :  { %542 = vmatprep.subr.bf16.mxu1 %v605_v1  ;;  %v470_v35 = vld [vmem:[%s762_s2] ss:$0 sm:$0xff]  ;;  %v599_v43 = vld [vmem:[%s761_s5 + $0x8] sm:$0x1f]  }
   0xb   :  { %509 = vmatpush3.bf16.msra.mxu0 %v578_v6  ;;  %v403_v47 = vand.u32 %v599_v43, %v401_v45  ;;  %v600_v49 = vld [vmem:[%s761_s5] sm:$0xff]   ;;  %s608_s5 = smov 127  }
   0xc   :  { %510 = vmatprep.subr.bf16.mxu0 %v579_v7  ;;  %v494_v50 = vld [vmem:[%s763_s4] ss:$0 sm:$0xff]  ;;  %s609_s4 = smov 1  }
   0xd   :  { %543 = vmatpush3.bf16.msra.mxu1 %v591_v16  ;;  %v500_v58 = vld [vmem:[%s764_s6] ss:$0 sm:$0xff] }
   0xe   :  { %548 = vmatprep.subr.bf16.mxu1 %v605_v1 }
   0xf   :  { %511 = vmatpush3.bf16.msra.mxu0 %v580_v8 }
  0x10   :  { %512 = vmatprep.subr.bf16.mxu0 %v581_v9  ;;  %545 = vmatmul.mubr.msk.bf16.vlgmr.msra.gmra.mxu1 %vm197_vm3, %v594_v21 }
  0x11   :  { %549 = vmatpush3.bf16.msra.mxu1 %v328_v24  ;;  %556 = vmatprep.mubr.msk.bf16.mxu1 %vm606_vm0, %v605_v1 }
  0x12   :  { %550 = vmatprep.subr.bf16.mxu1 %v605_v1 }
  0x13   :  { %513 = vmatpush3.bf16.msra.mxu0 %v582_v11 }
  0x14   :  { %514 = vmatprep.subr.bf16.mxu0 %v583_v14 }
  0x15   :  { %551 = vmatpush3.bf16.msra.mxu1 %v596_v27 }
  0x16   :  { %552 = vmatprep.subr.bf16.mxu1 %v605_v1 }
  0x17   :  { %515 = vmatpush3.bf16.msra.mxu0 %v584_v15 }
  0x18   :  { %516 = vmatprep.subr.bf16.mxu0 %v586_v18 }
  0x19   :  { %553 = vmatpush3.bf16.msra.mxu1 %v597_v28 }
  0x1a   :  { %554 = vmatprep.subr.bf16.mxu1 %v605_v1 }
  0x1b   :  { %517 = vmatpush3.bf16.msra.mxu0 %v587_v22 }
  0x1c   :  { %518 = vmatprep.subr.bf16.mxu0 %v589_v23 }
  0x1d   :  { %555 = vmatpush3.bf16.msra.mxu1 %v598_v29 }
  0x1e   :  { %560 = vmatprep.subr.bf16.mxu1 %v605_v1 }
  0x1f   :  { %519 = vmatpush3.bf16.msra.mxu0 %v590_v25 }
  0x22   :  { %238 = vmatmul.mubr.bf16.vlgmr.msra.gmra.mxu0 %v471_v26 }
  0xd0   :  { %v279_v30 = vpop.f32.mrf.mxu1 }
  0xd2   :  { %v546_v31 = vpop.f32.mrf.mxu1 }
  0xd4   :  { %v282_v32 = vpop.f32.mrf.mxu1 }
  0xd6   :  { %v547_v33 = vpop.f32.mrf.mxu1 }
  0xe2   :  { %v520_v34 = vpop.f32.mrf.mxu0 }
  0xe4   :  { %v521_v36 = vpop.f32.mrf.mxu0 }
  0xe5   :  { %v522_v37 = vadd.f32 %v521_v36, %v520_v34 }
  0xe6   :  { %v523_v38 = vpop.f32.mrf.mxu0 }
  0xe7   :  { %v240_v41 = vadd.f32 %v522_v37, %v470_v35 }
  0xe8   :  { %v524_v42 = vpop.f32.mrf.mxu0 }
  0xe9   :  { %v280_v44 = vadd.f32 %v279_v30, %v240_v41 }
  0xeb   :  { %v285_v46 = vmax.f32 %v280_v44, 0.0 }
  0xed   :  { %v286_v48 = vpack.c.bf16 %v285_v46, %v285_v46 }
  0xef   :  { %557 = vmatmul.mubr.msk.bf16.vlgmr.msra.gmra.mxu1 %vm322_vm6, %v286_v48 }
  0xf0   :  { %561 = vmatpush3.bf16.msra.mxu1 %v403_v47  ;;  %564 = vmatprep.mubr.msk.bf16.mxu1 %vm606_vm0, %v605_v1 }
  0xf1   :  { %562 = vmatprep.subr.bf16.mxu1 %v605_v1 }
  0xf4   :  { %563 = vmatpush3.bf16.msra.mxu1 %v600_v49 }
 0x1af   :  { %v364_v51 = vpop.f32.mrf.mxu1 }
 0x1b0   :  { %v365_v52 = vadd.f32 %v494_v50, %v364_v51 }
 0x1b1   :  { %v558_v53 = vpop.f32.mrf.mxu1 }
 0x1b2   :  { %v370_v54 = vmax.f32 %v365_v52, 0.0 }
 0x1b3   :  { %v367_v55 = vpop.f32.mrf.mxu1 }
 0x1b4   :  { %v371_v56 = vpack.c.bf16 %v370_v54, %v370_v54 }
 0x1b5   :  { %v559_v57 = vpop.f32.mrf.mxu1 }
 0x1b6   :  { %565 = vmatmul.mubr.msk.bf16.vlgmr.msra.gmra.mxu1 %vm394_vm7, %v371_v56 }
 0x276   :  { %v439_v59 = vpop.f32.mrf.mxu1 }
 0x277   :  { %v440_v60 = vadd.f32 %v500_v58, %v439_v59 }
 0x278   :  { %v566_v61 = vpop.f32.mrf.mxu1 }
 0x279   :  { %v445_v62 = vmax.f32 %v440_v60, 0.0 }
 0x27a   :  { %v442_v63 = vpop.f32.mrf.mxu1 }
 0x27b   :  { %447 = vrot.lane.b32.xlu0 %v445_v62, %s608_s5 }
 0x27c   :  { %v567_v0 = vpop.f32.mrf.mxu1 }
 0x2ed   :  { %v448_v1 = vpop.permute.xlu0 %447 }
 0x2ee   :  { %v450_v2 = vsub.f32 %v445_v62, %v448_v1 }
 0x2f0   :  { %v451_v3 = vsub.f32 0.0, %v450_v2 }
 0x2f2   :  { %v452_v4 = vmul.f32 1.442695, %v451_v3 }
 0x2f4   :  { %601 = vpow2.f32 %v452_v4 }
 0x301   :  { %v602_v5 = vpop.eup %601 }
 0x302   :  { %v454_v6 = vadd.f32 1.0, %v602_v5 }
 0x304   :  { %603 = vrcp.f32 %v454_v6 }
 0x311   :  { %v604_v7 = vpop.eup %603 }
 0x312   :  { %v457_v8 = vsub.f32 1.0, %v604_v7 }
 0x314   :  { %459 = vrot.lane.b32.xlu0 %v457_v8, %s609_s4 }
 0x386   :  { %v460_v9 = vpop.permute.xlu0 %459 }
 0x387   :  { %v463_v10 = vsel %vm462_vm8, %v604_v7, %v460_v9 }
 0x388   :  { %465 = vst.msk [vmem:[%s765_s7] sm:$0xff] %vm464_vm9, %v463_v10 }

</bundles_post_ra>
